<compile_context>
chip_gen: v6e
topology: v6e:2x2x1
jax: 0.10.0
libtpu: 0.0.40
codegen_flags: <defaults>
</compile_context>

<pallas_src>
import jax
import jax.numpy as jnp
from jax.experimental import pallas as pl
from jax.experimental.pallas import tpu as pltpu

LANE = 128     # TPU lane width (last-dim vector width)
SUBLANE = 8    # TPU sublane width


def _round_up(n, m):
    return ((n + m - 1) // m) * m


def critic_mlp_kernel(x_ref, w1_ref, b1_ref, w2_ref, b2_ref, w3t_ref, b3_ref,
                      o_ref):
    """Fused relu(x@W1+b1) -> relu(@W2+b2) -> W3t@(.)^T + b3 on one batch tile.

    Layers 1/2 run on the MXU with bf16 operands and f32 accumulation; bias
    add + ReLU on the VPU in f32.  The final (tiny) layer is computed
    transposed in f32 so the output tile is (8, tile_b): lane-dense over the
    batch, full unmasked stores, minimal HBM writeback.
    """
    cdt = w1_ref.dtype                              # compute dtype (bf16)
    x = x_ref[...].astype(cdt)                      # f32 -> bf16 cast on VPU
    h1 = jnp.dot(x, w1_ref[...], preferred_element_type=jnp.float32)
    h1 = jnp.maximum(h1 + b1_ref[...], 0.0).astype(cdt)
    h2 = jnp.dot(h1, w2_ref[...], preferred_element_type=jnp.float32)
    h2 = jnp.maximum(h2 + b2_ref[...], 0.0)         # stays f32
    # Transposed final layer: (8, H) @ (H, tb) -> (8, tb).  Row 0 carries the
    # real fc3 weights; rows 1..7 are zero padding for full sublanes.
    out = jnp.dot(w3t_ref[...], h2.T, preferred_element_type=jnp.float32)
    o_ref[...] = out + b3_ref[...]


def critic_forward(x, params, *, tile_b=512, compute_dtype=jnp.bfloat16):
    """Runs the fused 3-layer MLP via a single pallas_call, tiled over batch."""
    w1, b1, w2, b2, w3, b3 = params
    B, D = x.shape
    H = w1.shape[1]          # 128

    # --- final layer stored transposed and sublane-padded: (H,1) -> (8,H).
    # Kept in f32 (tiny matmul); row 0 holds the real weights/bias.
    w3t = jnp.zeros((SUBLANE, H), jnp.float32).at[0, :].set(
        w3[:, 0].astype(jnp.float32))
    b3p = jnp.zeros((SUBLANE, 1), jnp.float32).at[0, 0].set(
        jnp.reshape(b3, ()).astype(jnp.float32))

    # --- batch tiling: tiles are a multiple of the lane width so the
    # transposed output store is always a full-lane unmasked vst.
    tb = min(tile_b, _round_up(B, LANE))
    Bp = _round_up(B, tb)
    if Bp != B:
        x = jnp.pad(x, ((0, Bp - B), (0, 0)))
    grid = (Bp // tb,)

    # bf16 weights for the two big matmuls (halved DMA bytes, native MXU
    # rate); biases stay f32 (added to the f32 accumulator).
    w1c = w1.astype(compute_dtype)
    w2c = w2.astype(compute_dtype)
    b1c = b1.astype(jnp.float32).reshape(1, H)
    b2c = b2.astype(jnp.float32).reshape(1, H)

    flops = 2 * Bp * (D * H + H * H + H * SUBLANE)
    bytes_accessed = (
        x.size * x.dtype.itemsize
        + sum(a.size * a.dtype.itemsize
              for a in (w1c, b1c, w2c, b2c, w3t, b3p))
        + SUBLANE * Bp * 4)

    out = pl.pallas_call(
        critic_mlp_kernel,
        out_shape=jax.ShapeDtypeStruct((SUBLANE, Bp), jnp.float32),
        grid_spec=pltpu.PrefetchScalarGridSpec(
            num_scalar_prefetch=0,
            grid=grid,
            in_specs=[
                # x: tiled along batch (rows), cast to bf16 inside the kernel
                pl.BlockSpec((tb, D), lambda i: (i, 0)),
                # weights / biases: full blocks, resident across batch tiles
                pl.BlockSpec((D, H), lambda i: (0, 0)),
                pl.BlockSpec((1, H), lambda i: (0, 0)),
                pl.BlockSpec((H, H), lambda i: (0, 0)),
                pl.BlockSpec((1, H), lambda i: (0, 0)),
                pl.BlockSpec((SUBLANE, H), lambda i: (0, 0)),  # W3^T (padded)
                pl.BlockSpec((SUBLANE, 1), lambda i: (0, 0)),  # b3 (padded)
            ],
            # batch on the lane axis of the output -> lane-dense compact store
            out_specs=pl.BlockSpec((SUBLANE, tb), lambda i: (0, i)),
        ),
        compiler_params=pltpu.CompilerParams(
            dimension_semantics=("parallel",)),   # feeds both v7x TensorCores
        cost_estimate=pl.CostEstimate(
            flops=flops, transcendentals=0, bytes_accessed=bytes_accessed),
    )(x, w1c, b1c, w2c, b2c, w3t, b3p)

    # Row 0 holds the real fc3 output; strip batch padding, restore (B, 1).
    return out[0, :B].reshape(B, 1)


def init_params(key, input_dim, hidden=128):
    """nn.Linear-style init (uniform +/- 1/sqrt(fan_in)); W stored [in, out]."""
    ks = jax.random.split(key, 6)

    def lin(kw, kb, fan_in, fan_out):
        bound = 1.0 / jnp.sqrt(fan_in)
        w = jax.random.uniform(kw, (fan_in, fan_out), jnp.float32,
                               -bound, bound)
        b = jax.random.uniform(kb, (1, fan_out), jnp.float32, -bound, bound)
        return w, b

    w1, b1 = lin(ks[0], ks[1], input_dim, hidden)
    w2, b2 = lin(ks[2], ks[3], hidden, hidden)
    w3, b3 = lin(ks[4], ks[5], hidden, 1)
    return (w1, b1, w2, b2, w3, b3)


def reference_forward(x, params, dtype=jnp.float32):
    """Plain-JAX reference; `dtype` controls operand precision."""
    w1, b1, w2, b2, w3, b3 = params
    xc = x.astype(dtype)
    h1 = jnp.dot(xc, w1.astype(dtype), preferred_element_type=jnp.float32) + b1
    h1 = jnp.maximum(h1, 0.0).astype(dtype)
    h2 = jnp.dot(h1, w2.astype(dtype), preferred_element_type=jnp.float32) + b2
    h2 = jnp.maximum(h2, 0.0).astype(dtype)
    return jnp.dot(h2, w3.astype(dtype),
                   preferred_element_type=jnp.float32) + b3


if __name__ == "__main__":
    key = jax.random.PRNGKey(0)
    k_x, k_p = jax.random.split(key)

    # Small case: single-tile launch (grid=(1,)).
    batch, input_dim = 16, 32
    x = jax.random.normal(k_x, (batch, input_dim), jnp.float32)
    params = init_params(k_p, input_dim)

    out = jax.block_until_ready(critic_forward(x, params))
    assert out.shape == (batch, 1)
    ref_f32 = reference_forward(x, params, jnp.float32)
    assert jnp.allclose(out, ref_f32, atol=5e-2, rtol=5e-2)

    # Non-multiple batch: exercises the multi-tile grid + zero-padding path.
    k_x2, _ = jax.random.split(k_x)
    x2 = jax.random.normal(k_x2, (300, input_dim), jnp.float32)
    out2 = jax.block_until_ready(critic_forward(x2, params, tile_b=128))
    assert out2.shape == (300, 1)
    assert jnp.allclose(out2, reference_forward(x2, params, jnp.float32),
                        atol=5e-2, rtol=5e-2)

    print("KERNEL_OK")
</pallas_src>

<mosaic_0001>
module attributes {stable_mosaic.version = 11 : i64} {
  func.func @critic_mlp_kernel(%arg0: i32, %arg1: memref<128x32xf32, #tpu.memory_space<vmem>>, %arg2: memref<32x128xbf16, #tpu.memory_space<vmem>>, %arg3: memref<1x128xf32, #tpu.memory_space<vmem>>, %arg4: memref<128x128xbf16, #tpu.memory_space<vmem>>, %arg5: memref<1x128xf32, #tpu.memory_space<vmem>>, %arg6: memref<8x128xf32, #tpu.memory_space<vmem>>, %arg7: memref<8x1xf32, #tpu.memory_space<vmem>>, %arg8: memref<8x128xf32, #tpu.memory_space<vmem>>) attributes {dimension_semantics = [#tpu.dimension_semantics<parallel>], iteration_bounds = array<i64: 1>, scalar_prefetch = 0 : i64, scratch_operands = 0 : i64, tpu.core_type = #tpu.core_type<tc>, window_params = [{transform_indices = @transform_0, window_bounds = array<i64: 128, 32>}, {pipeline_mode = #tpu.pipeline_mode<synchronous>, transform_indices = @transform_1, window_bounds = array<i64: 32, 128>}, {pipeline_mode = #tpu.pipeline_mode<synchronous>, transform_indices = @transform_2, window_bounds = array<i64: 1, 128>}, {pipeline_mode = #tpu.pipeline_mode<synchronous>, transform_indices = @transform_3, window_bounds = array<i64: 128, 128>}, {pipeline_mode = #tpu.pipeline_mode<synchronous>, transform_indices = @transform_4, window_bounds = array<i64: 1, 128>}, {pipeline_mode = #tpu.pipeline_mode<synchronous>, transform_indices = @transform_5, window_bounds = array<i64: 8, 128>}, {pipeline_mode = #tpu.pipeline_mode<synchronous>, transform_indices = @transform_6, window_bounds = array<i64: 8, 1>}, {transform_indices = @transform_7, window_bounds = array<i64: 8, 128>}]} {
    %c0 = arith.constant 0 : index
    %c0_0 = arith.constant 0 : index
    %0 = vector.load %arg1[%c0, %c0_0] : memref<128x32xf32, #tpu.memory_space<vmem>>, vector<128x32xf32>
    %1 = arith.truncf %0 : vector<128x32xf32> to vector<128x32xbf16>
    %c0_1 = arith.constant 0 : index
    %c0_2 = arith.constant 0 : index
    %2 = vector.load %arg2[%c0_1, %c0_2] : memref<32x128xbf16, #tpu.memory_space<vmem>>, vector<32x128xbf16>
    %cst = arith.constant dense<0.000000e+00> : vector<128x128xf32>
    %3 = tpu.matmul %1, %2, %cst {dimension_numbers = #tpu.dot_dimension_numbers<[1], [0], [0], [1], [0, 0, 1, 1], [], []>} : vector<128x32xbf16>, vector<32x128xbf16>, vector<128x128xf32> -> vector<128x128xf32>
    %c0_3 = arith.constant 0 : index
    %c0_4 = arith.constant 0 : index
    %4 = vector.load %arg3[%c0_3, %c0_4] : memref<1x128xf32, #tpu.memory_space<vmem>>, vector<1x128xf32>
    %5 = vector.broadcast %4 : vector<1x128xf32> to vector<128x128xf32>
    %6 = arith.addf %3, %5 : vector<128x128xf32>
    %cst_5 = arith.constant 0.000000e+00 : f32
    %7 = vector.broadcast %cst_5 : f32 to vector<128x128xf32>
    %8 = arith.maximumf %6, %7 : vector<128x128xf32>
    %9 = arith.truncf %8 : vector<128x128xf32> to vector<128x128xbf16>
    %c0_6 = arith.constant 0 : index
    %c0_7 = arith.constant 0 : index
    %10 = vector.load %arg4[%c0_6, %c0_7] : memref<128x128xbf16, #tpu.memory_space<vmem>>, vector<128x128xbf16>
    %cst_8 = arith.constant dense<0.000000e+00> : vector<128x128xf32>
    %11 = tpu.matmul %9, %10, %cst_8 {dimension_numbers = #tpu.dot_dimension_numbers<[1], [0], [0], [1], [0, 0, 1, 1], [], []>} : vector<128x128xbf16>, vector<128x128xbf16>, vector<128x128xf32> -> vector<128x128xf32>
    %c0_9 = arith.constant 0 : index
    %c0_10 = arith.constant 0 : index
    %12 = vector.load %arg5[%c0_9, %c0_10] : memref<1x128xf32, #tpu.memory_space<vmem>>, vector<1x128xf32>
    %13 = vector.broadcast %12 : vector<1x128xf32> to vector<128x128xf32>
    %14 = arith.addf %11, %13 : vector<128x128xf32>
    %cst_11 = arith.constant 0.000000e+00 : f32
    %15 = vector.broadcast %cst_11 : f32 to vector<128x128xf32>
    %16 = arith.maximumf %14, %15 : vector<128x128xf32>
    %c0_12 = arith.constant 0 : index
    %c0_13 = arith.constant 0 : index
    %17 = vector.load %arg6[%c0_12, %c0_13] : memref<8x128xf32, #tpu.memory_space<vmem>>, vector<8x128xf32>
    %18 = tpu.transpose %16, [1, 0] : vector<128x128xf32> -> vector<128x128xf32>
    %cst_14 = arith.constant dense<0.000000e+00> : vector<8x128xf32>
    %19 = tpu.matmul %17, %18, %cst_14 {dimension_numbers = #tpu.dot_dimension_numbers<[1], [0], [0], [1], [0, 0, 1, 1], [], []>} : vector<8x128xf32>, vector<128x128xf32>, vector<8x128xf32> -> vector<8x128xf32>
    %c0_15 = arith.constant 0 : index
    %c0_16 = arith.constant 0 : index
    %20 = vector.load %arg7[%c0_15, %c0_16] : memref<8x1xf32, #tpu.memory_space<vmem>>, vector<8x1xf32>
    %21 = vector.broadcast %20 : vector<8x1xf32> to vector<8x128xf32>
    %22 = arith.addf %19, %21 : vector<8x128xf32>
    %c0_17 = arith.constant 0 : index
    %c0_18 = arith.constant 0 : index
    %23 = vector.load %arg8[%c0_17, %c0_18] : memref<8x128xf32, #tpu.memory_space<vmem>>, vector<8x128xf32>
    tpu.vector_store %arg8[%c0_17, %c0_18], %22 {strides = array<i32>} : memref<8x128xf32, #tpu.memory_space<vmem>>, vector<8x128xf32>,
    return
  }
  func.func @transform_0(%arg0: i32) -> (i32, i32) {
    %c0_i32 = arith.constant 0 : i32
    %c0_i32_0 = arith.constant 0 : i32
    return %arg0, %c0_i32 : i32, i32
  }
  func.func @transform_1(%arg0: i32) -> (i32, i32) {
    %c0_i32 = arith.constant 0 : i32
    %c0_i32_0 = arith.constant 0 : i32
    %c0_i32_1 = arith.constant 0 : i32
    return %c0_i32, %c0_i32_0 : i32, i32
  }
  func.func @transform_2(%arg0: i32) -> (i32, i32) {
    %c0_i32 = arith.constant 0 : i32
    %c0_i32_0 = arith.constant 0 : i32
    %c0_i32_1 = arith.constant 0 : i32
    return %c0_i32, %c0_i32_0 : i32, i32
  }
  func.func @transform_3(%arg0: i32) -> (i32, i32) {
    %c0_i32 = arith.constant 0 : i32
    %c0_i32_0 = arith.constant 0 : i32
    %c0_i32_1 = arith.constant 0 : i32
    return %c0_i32, %c0_i32_0 : i32, i32
  }
  func.func @transform_4(%arg0: i32) -> (i32, i32) {
    %c0_i32 = arith.constant 0 : i32
    %c0_i32_0 = arith.constant 0 : i32
    %c0_i32_1 = arith.constant 0 : i32
    return %c0_i32, %c0_i32_0 : i32, i32
  }
  func.func @transform_5(%arg0: i32) -> (i32, i32) {
    %c0_i32 = arith.constant 0 : i32
    %c0_i32_0 = arith.constant 0 : i32
    %c0_i32_1 = arith.constant 0 : i32
    return %c0_i32, %c0_i32_0 : i32, i32
  }
  func.func @transform_6(%arg0: i32) -> (i32, i32) {
    %c0_i32 = arith.constant 0 : i32
    %c0_i32_0 = arith.constant 0 : i32
    %c0_i32_1 = arith.constant 0 : i32
    return %c0_i32, %c0_i32_0 : i32, i32
  }
  func.func @transform_7(%arg0: i32) -> (i32, i32) {
    %c0_i32 = arith.constant 0 : i32
    %c0_i32_0 = arith.constant 0 : i32
    return %c0_i32, %arg0 : i32, i32
  }
}

</mosaic_0001>

<bundles_post_ra>
// kernel: tpu_custom_call.1
= control target key start
LH: loop header
LB: loop body
LE: loop exit
PB: predicated region body
PF: predicated region fallthrough
CT: control target
= control target key end

     0   :  { %vm75_vm0 = vcmask 261120   ;;  %s855_s0 = inlined_call_operand.vmem [shape: f32[128,32], index: 0, kind: input, shape index: {}]   ;;  %s856_s1 = inlined_call_operand.vmem [shape: bf16[32,128], index: 1, kind: input, shape index: {}]   ;;  %s857_s2 = inlined_call_operand.vmem [shape: f32[1,128], index: 2, kind: input, shape index: {}]   ;;  %s858_s3 = inlined_call_operand.vmem [shape: bf16[128,128], index: 3, kind: input, shape index: {}]   ;;  %s859_s4 = inlined_call_operand.vmem [shape: f32[1,128], index: 4, kind: input, shape index: {}]   ;;  %s860_s5 = inlined_call_operand.vmem [shape: f32[8,128], index: 5, kind: input, shape index: {}]   ;;  %s861_s6 = inlined_call_operand.vmem [shape: f32[8,1], index: 6, kind: input, shape index: {}]   ;;  %s862_s7 = inlined_call_operand.hbm [shape: f32[8,128], index: 7, kind: output, shape index: {}]  }
   0x1   :  { %v652_v0 = vld [vmem:[%s856_s1 + $0x8] sm:$0xff]   ;;  %v653_v1 = vld [vmem:[%s856_s1] sm:$0xff]   ;;  %v30_v5 = vld [vmem:[%s855_s0 + $0x10] sm:$0xff] }
   0x2   :  { %560 = vmatprep.subr.bf16.mxu1 %v652_v0  ;;  %v28_v2 = vld [vmem:[%s855_s0] sm:$0xff]  ;;  %v29_v3 = vld [vmem:[%s855_s0 + $0x8] sm:$0xff]  ;;  %v31_v6 = vld [vmem:[%s855_s0 + $0x18] sm:$0xff] }
   0x3   :  { %561 = vmatpush3.bf16.msra.mxu1 %v652_v0  ;;  %v44_v4 = vpack.c.bf16 %v29_v3, %v28_v2  ;;  %v32_v7 = vld [vmem:[%s855_s0 + $0x20] sm:$0xff]  ;;  %v33_v8 = vld [vmem:[%s855_s0 + $0x28] sm:$0xff]  ;;  %v45_v9 = vpack.c.bf16 %v31_v6, %v30_v5  ;;  %v654_v11 = vld [vmem:[%s858_s3 + $0x38] sm:$0xff]  }
   0x4   :  { %562 = vmatprep.subr.bf16.mxu1 %v653_v1  ;;  %v46_v10 = vpack.c.bf16 %v33_v8, %v32_v7  ;;  %v34_v12 = vld [vmem:[%s855_s0 + $0x30] sm:$0xff]  ;;  %v35_v13 = vld [vmem:[%s855_s0 + $0x38] sm:$0xff]  ;;  %v36_v15 = vld [vmem:[%s855_s0 + $0x40] sm:$0xff] }
   0x5   :  { %564 = vmatprep.mubr.msk.bf16.mxu1 %vm75_vm0, %v44_v4  ;;  %v655_v14 = vld [vmem:[%s858_s3 + $0x30] sm:$0xff]   ;;  %v37_v16 = vld [vmem:[%s855_s0 + $0x48] sm:$0xff]  ;;  %v47_v18 = vpack.c.bf16 %v35_v13, %v34_v12 }
   0x6   :  { %v656_v17 = vld [vmem:[%s858_s3 + $0x28] sm:$0xff]  }
   0x7   :  { %563 = vmatpush3.bf16.msra.mxu1 %v653_v1 }
   0x8   :  { %580 = vmatprep.subr.bf16.mxu1 %v654_v11 }
   0xa   :  { %565 = vmatmul.mubr.msk.bf16.vlgmr.msra.gmra.mxu1 %vm75_vm0, %v45_v9 }
   0xb   :  { %568 = vmatprep.mubr.msk.bf16.mxu1 %vm75_vm0, %v46_v10  ;;  %581 = vmatpush3.bf16.msra.mxu1 %v654_v11 }
   0xc   :  { %582 = vmatprep.subr.bf16.mxu1 %v655_v14 }
   0xd   :  { %12 = vsyncpa [#allocation3], 0  ;;  %v48_v19 = vpack.c.bf16 %v37_v16, %v36_v15  ;;  %v657_v20 = vld [vmem:[%s858_s3 + $0x20] sm:$0xff]   ;;  %v38_v21 = vld [vmem:[%s855_s0 + $0x50] sm:$0xff]  ;;  %vm685_vm1 = vmmov 0   ;;  %s687_s8 = smov [#allocation2]  }
   0xe   :  { %v39_v22 = vld [vmem:[%s855_s0 + $0x58] sm:$0xff]  ;;  %v40_v23 = vld [vmem:[%s855_s0 + $0x60] sm:$0xff]  ;;  %v41_v24 = vld [vmem:[%s855_s0 + $0x68] sm:$0xff]  ;;  %s489_s9 = sshll.u32 %s687_s8, 4  ;;  %s490_s9 = int_to_ptr.vmem [resolvable:$true] %s489_s9 }
   0xf   :  { %583 = vmatpush3.bf16.msra.mxu1 %v655_v14  ;;  %v658_v25 = vld [vmem:[%s858_s3 + $0x18] sm:$0xff]   ;;  %v49_v26 = vpack.c.bf16 %v39_v22, %v38_v21  ;;  %v50_v27 = vpack.c.bf16 %v41_v24, %v40_v23  ;;  %v42_v28 = vld [vmem:[%s855_s0 + $0x70] sm:$0xff]  ;;  %v660_v32 = vld [vmem:[%s858_s3 + $0x8] sm:$0xff]   ;;  %s662_s10 = scalar_lea.vmem %s490_s9, 128  ;;  %p667_p1 = scmp.lt.s32.totalorder %s490_s9, %s490_s9 }
  0x10   :  { %584 = vmatprep.subr.bf16.mxu1 %v656_v17  ;;  %v43_v29 = vld [vmem:[%s855_s0 + $0x78] sm:$0xff]  ;;  %v659_v31 = vld [vmem:[%s858_s3 + $0x10] sm:$0xff]   ;;  %v661_v33 = vld [vmem:[%s858_s3] sm:$0xff]   ;;  %p663_p0 = scmp.ne.s32.totalorder %s490_s9, %s662_s10  ;;  %p668_p2 = scmp.lt.s32.totalorder %s662_s10, %s662_s10 }
  0x11   :  { %v51_v30 = vpack.c.bf16 %v43_v29, %v42_v28  ;;  %v497_v36 = vld [vmem:[%s857_s2] ss:$0 sm:$0xff]  ;;  %v686_v29 = vmov 0  }
  0x12   :  { %569 = vmatmul.mubr.msk.bf16.gmra.mxu1 %vm75_vm0, %v47_v18  ;;  %v406_v28 = vld [vmem:[%s861_s6] sm:$0xff]  ;;  %651 = vset.pattern.permute.xlu0 %v686_v29  ;;  %p669_p3 = por %p668_p2, %p667_p1 }
  0x13   :  { %572 = vmatprep.mubr.msk.bf16.mxu1 %vm75_vm0, %v48_v19  ;;  %585 = vmatpush3.bf16.msra.mxu1 %v656_v17 }
  0x14   :  { %586 = vmatprep.subr.bf16.mxu1 %v657_v20  ;;  %409 = vperm.xlu0 %651, %v406_v28   ;;  %p670_p4 = pnand %p669_p3, %p663_p0 }
  0x17   :  { %587 = vmatpush3.bf16.msra.mxu1 %v657_v20 }
  0x18   :  { %588 = vmatprep.subr.bf16.mxu1 %v658_v25 }
  0x1a   :  { %573 = vmatmul.mubr.msk.bf16.gmra.mxu1 %vm75_vm0, %v49_v26 }
  0x1b   :  { %576 = vmatprep.mubr.msk.bf16.mxu1 %vm75_vm0, %v50_v27  ;;  %589 = vmatpush3.bf16.msra.mxu1 %v658_v25  ;;  %v684_v27 = vmov 0.0  }
  0x1c   :  { %590 = vmatprep.subr.bf16.mxu1 %v659_v31  ;;  %612 = vmatprep.subr.mxu0 %v684_v27 }
  0x1d   :  { %644 = vmatprep.mubr.msk.f32.mxu0 %vm685_vm1, %v684_v27 }
  0x1f   :  { %591 = vmatpush3.bf16.msra.mxu1 %v659_v31 }
  0x20   :  { %592 = vmatprep.subr.bf16.mxu1 %v660_v32 }
  0x22   :  { %577 = vmatmul.mubr.msk.bf16.gmra.mxu1 %vm75_vm0, %v51_v30 }
  0x23   :  { %593 = vmatpush3.bf16.msra.mxu1 %v660_v32 }
  0x24   :  { %594 = vmatprep.subr.bf16.mxu1 %v661_v33 }
  0x27   :  { %595 = vmatpush3.bf16.msra.mxu1 %v661_v33 }
  0xca   :  { %v566_v34 = vpop.f32.mrf.mxu1 }
  0xcb   :  { %v143_v40 = vadd.f32 %v566_v34, %v497_v36 }
  0xcc   :  { %v134_v35 = vpop.f32.mrf.mxu1 }
  0xcd   :  { %v135_v38 = vadd.f32 %v497_v36, %v134_v35  ;;  %v199_v47 = vmax.f32 %v143_v40, 0.0 }
  0xce   :  { %v567_v37 = vpop.f32.mrf.mxu1 }
  0xcf   :  { %v146_v39 = vadd.f32 %v567_v37, %v497_v36  ;;  %v197_v45 = vmax.f32 %v135_v38, 0.0 }
  0xd0   :  { %v137_v41 = vpop.f32.mrf.mxu1 }
  0xd1   :  { %v138_v42 = vadd.f32 %v497_v36, %v137_v41  ;;  %v200_v43 = vmax.f32 %v146_v39, 0.0 }
  0xd2   :  { %v570_v44 = vpop.f32.mrf.mxu1 }
  0xd3   :  { %v198_v46 = vmax.f32 %v138_v42, 0.0  ;;  %v214_v50 = vpack.c.bf16 %v200_v43, %v199_v47  ;;  %v159_v54 = vadd.f32 %v570_v44, %v497_v36  ;;  %v508_v44 = vld [vmem:[%s859_s4] ss:$0 sm:$0xff] }
  0xd4   :  { %v150_v48 = vpop.f32.mrf.mxu1 }
  0xd5   :  { %v213_v49 = vpack.c.bf16 %v198_v46, %v197_v45  ;;  %v151_v52 = vadd.f32 %v497_v36, %v150_v48  ;;  %v203_v61 = vmax.f32 %v159_v54, 0.0 }
  0xd6   :  { %v571_v51 = vpop.f32.mrf.mxu1 }
  0xd7   :  { %v162_v53 = vadd.f32 %v571_v51, %v497_v36  ;;  %596 = vmatprep.mubr.bf16.mxu1 %v213_v49  ;;  %v201_v59 = vmax.f32 %v151_v52, 0.0 }
  0xd8   :  { %v153_v55 = vpop.f32.mrf.mxu1  ;;  %597 = vmatmul.mubr.bf16.vlgmr.msra.gmra.mxu1 %v214_v50 }
  0xd9   :  { %v154_v56 = vadd.f32 %v497_v36, %v153_v55  ;;  %v204_v57 = vmax.f32 %v162_v53, 0.0 }
  0xda   :  { %v574_v58 = vpop.f32.mrf.mxu1 }
  0xdb   :  { %v202_v60 = vmax.f32 %v154_v56, 0.0  ;;  %v216_v0 = vpack.c.bf16 %v204_v57, %v203_v61  ;;  %v175_v4 = vadd.f32 %v574_v58, %v497_v36 }
  0xdc   :  { %v166_v62 = vpop.f32.mrf.mxu1 }
  0xdd   :  { %v215_v63 = vpack.c.bf16 %v202_v60, %v201_v59  ;;  %v167_v2 = vadd.f32 %v497_v36, %v166_v62  ;;  %v207_v11 = vmax.f32 %v175_v4, 0.0 }
  0xde   :  { %v575_v1 = vpop.f32.mrf.mxu1 }
  0xdf   :  { %v178_v3 = vadd.f32 %v575_v1, %v497_v36  ;;  %600 = vmatprep.mubr.bf16.mxu1 %v215_v63  ;;  %v205_v9 = vmax.f32 %v167_v2, 0.0 }
  0xe0   :  { %v169_v5 = vpop.f32.mrf.mxu1  ;;  %601 = vmatmul.mubr.bf16.gmra.mxu1 %v216_v0 }
  0xe1   :  { %v170_v6 = vadd.f32 %v497_v36, %v169_v5  ;;  %v208_v7 = vmax.f32 %v178_v3, 0.0 }
  0xe2   :  { %v578_v8 = vpop.f32.mrf.mxu1 }
  0xe3   :  { %v206_v10 = vmax.f32 %v170_v6, 0.0  ;;  %v218_v14 = vpack.c.bf16 %v208_v7, %v207_v11  ;;  %v191_v18 = vadd.f32 %v578_v8, %v497_v36 }
  0xe4   :  { %v182_v12 = vpop.f32.mrf.mxu1 }
  0xe5   :  { %v217_v13 = vpack.c.bf16 %v206_v10, %v205_v9  ;;  %v183_v16 = vadd.f32 %v497_v36, %v182_v12  ;;  %v211_v24 = vmax.f32 %v191_v18, 0.0 }
  0xe6   :  { %v579_v15 = vpop.f32.mrf.mxu1 }
  0xe7   :  { %v194_v17 = vadd.f32 %v579_v15, %v497_v36  ;;  %604 = vmatprep.mubr.bf16.mxu1 %v217_v13  ;;  %v209_v22 = vmax.f32 %v183_v16, 0.0  ;;  %v405_v15 = vld [vmem:[%s860_s5] sm:$0xff]  ;;  %v410_v16 = vpop.permute.xlu0 %409 }
  0xe8   :  { %v185_v19 = vpop.f32.mrf.mxu1  ;;  %605 = vmatmul.mubr.bf16.gmra.mxu1 %v218_v14 }
  0xe9   :  { %v186_v20 = vadd.f32 %v497_v36, %v185_v19  ;;  %v212_v21 = vmax.f32 %v194_v17, 0.0 }
  0xeb   :  { %v210_v23 = vmax.f32 %v186_v20, 0.0  ;;  %v220_v26 = vpack.c.bf16 %v212_v21, %v211_v24 }
  0xed   :  { %v219_v25 = vpack.c.bf16 %v210_v23, %v209_v22 }
  0xef   :  { %608 = vmatprep.mubr.bf16.mxu1 %v219_v25 }
  0xf0   :  { %609 = vmatmul.mubr.bf16.gmra.mxu1 %v220_v26 }
 0x198   :  { %v822_v30 = vpop.f32.mrf.mxu1 }
 0x199   :  { %v335_v8 = vadd.f32 %v822_v30, %v508_v44 }
 0x19a   :  { %v824_v31 = vpop.f32.mrf.mxu1 }
 0x19b   :  { %v391_v10 = vmax.f32 %v335_v8, 0.0  ;;  %v327_v12 = vadd.f32 %v508_v44, %v824_v31 }
 0x19c   :  { %v599_v32 = vpop.f32.mrf.mxu1 }
 0x19d   :  { %v338_v6 = vadd.f32 %v599_v32, %v508_v44  ;;  %v389_v14 = vmax.f32 %v327_v12, 0.0 }
 0x19e   :  { %v826_v33 = vpop.f32.mrf.mxu1 }
 0x19f   :  { %v392_v9 = vmax.f32 %v338_v6, 0.0  ;;  %v330_v11 = vadd.f32 %v508_v44, %v826_v33 }
 0x1a0   :  { %v602_v34 = vpop.f32.mrf.mxu1 }
 0x1a1   :  { %v351_v0 = vadd.f32 %v602_v34, %v508_v44  ;;  %v390_v13 = vmax.f32 %v330_v11, 0.0 }
 0x1a2   :  { %v342_v35 = vpop.f32.mrf.mxu1 }
 0x1a3   :  { %v395_v2 = vmax.f32 %v351_v0, 0.0  ;;  %v343_v4 = vadd.f32 %v508_v44, %v342_v35 }
 0x1a4   :  { %v603_v36 = vpop.f32.mrf.mxu1 }
 0x1a5   :  { %v354_v62 = vadd.f32 %v603_v36, %v508_v44  ;;  %v393_v7 = vmax.f32 %v343_v4, 0.0 }
 0x1a6   :  { %v345_v37 = vpop.f32.mrf.mxu1 }
 0x1a7   :  { %v396_v1 = vmax.f32 %v354_v62, 0.0  ;;  %v346_v3 = vadd.f32 %v508_v44, %v345_v37 }
 0x1a8   :  { %v606_v38 = vpop.f32.mrf.mxu1 }
 0x1a9   :  { %v367_v56 = vadd.f32 %v606_v38, %v508_v44  ;;  %v394_v5 = vmax.f32 %v346_v3, 0.0 }
 0x1aa   :  { %v358_v39 = vpop.f32.mrf.mxu1 }
 0x1ab   :  { %v399_v58 = vmax.f32 %v367_v56, 0.0  ;;  %v359_v60 = vadd.f32 %v508_v44, %v358_v39 }
 0x1ac   :  { %v607_v40 = vpop.f32.mrf.mxu1 }
 0x1ad   :  { %v370_v54 = vadd.f32 %v607_v40, %v508_v44  ;;  %v397_v63 = vmax.f32 %v359_v60, 0.0 }
 0x1ae   :  { %v361_v41 = vpop.f32.mrf.mxu1 }
 0x1af   :  { %v400_v57 = vmax.f32 %v370_v54, 0.0  ;;  %v362_v59 = vadd.f32 %v508_v44, %v361_v41 }
 0x1b0   :  { %v610_v42 = vpop.f32.mrf.mxu1 }
 0x1b1   :  { %v383_v47 = vadd.f32 %v610_v42, %v508_v44  ;;  %v398_v61 = vmax.f32 %v362_v59, 0.0 }
 0x1b2   :  { %v374_v43 = vpop.f32.mrf.mxu1 }
 0x1b3   :  { %v403_v50 = vmax.f32 %v383_v47, 0.0  ;;  %v375_v52 = vadd.f32 %v508_v44, %v374_v43 }
 0x1b4   :  { %v611_v45 = vpop.f32.mrf.mxu1 }
 0x1b5   :  { %v386_v46 = vadd.f32 %v611_v45, %v508_v44  ;;  %v401_v55 = vmax.f32 %v375_v52, 0.0 }
 0x1b6   :  { %v377_v49 = vpop.f32.mrf.mxu1 }
 0x1b7   :  { %v404_v48 = vmax.f32 %v386_v46, 0.0  ;;  %v378_v51 = vadd.f32 %v508_v44, %v377_v49 }
 0x1b9   :  { %613 = vmatpush3.xpose.msra.mxu0 %v404_v48  ;;  %v402_v53 = vmax.f32 %v378_v51, 0.0 }
 0x1ba   :  { %614 = vmatprep.subr.mxu0 %v684_v27 }
 0x1bd   :  { %615 = vmatpush3.xpose.msra.mxu0 %v403_v50 }
 0x1be   :  { %616 = vmatprep.subr.mxu0 %v684_v27 }
 0x1c1   :  { %617 = vmatpush3.xpose.msra.mxu0 %v402_v53 }
 0x1c2   :  { %618 = vmatprep.subr.mxu0 %v684_v27 }
 0x1c5   :  { %619 = vmatpush3.xpose.msra.mxu0 %v401_v55 }
 0x1c6   :  { %620 = vmatprep.subr.mxu0 %v684_v27 }
 0x1c9   :  { %621 = vmatpush3.xpose.msra.mxu0 %v400_v57 }
 0x1ca   :  { %622 = vmatprep.subr.mxu0 %v684_v27 }
 0x1cd   :  { %623 = vmatpush3.xpose.msra.mxu0 %v399_v58 }
 0x1ce   :  { %624 = vmatprep.subr.mxu0 %v684_v27 }
 0x1d1   :  { %625 = vmatpush3.xpose.msra.mxu0 %v398_v61 }
 0x1d2   :  { %626 = vmatprep.subr.mxu0 %v684_v27 }
 0x1d5   :  { %627 = vmatpush3.xpose.msra.mxu0 %v397_v63 }
 0x1d6   :  { %628 = vmatprep.subr.mxu0 %v684_v27 }
 0x1d9   :  { %629 = vmatpush3.xpose.msra.mxu0 %v396_v1 }
 0x1da   :  { %630 = vmatprep.subr.mxu0 %v684_v27 }
 0x1dd   :  { %631 = vmatpush3.xpose.msra.mxu0 %v395_v2 }
 0x1de   :  { %632 = vmatprep.subr.mxu0 %v684_v27 }
 0x1e1   :  { %633 = vmatpush3.xpose.msra.mxu0 %v394_v5 }
 0x1e2   :  { %634 = vmatprep.subr.mxu0 %v684_v27 }
 0x1e5   :  { %635 = vmatpush3.xpose.msra.mxu0 %v393_v7 }
 0x1e6   :  { %636 = vmatprep.subr.mxu0 %v684_v27 }
 0x1e9   :  { %637 = vmatpush3.xpose.msra.mxu0 %v392_v9 }
 0x1ea   :  { %638 = vmatprep.subr.mxu0 %v684_v27 }
 0x1ed   :  { %639 = vmatpush3.xpose.msra.mxu0 %v391_v10 }
 0x1ee   :  { %640 = vmatprep.subr.mxu0 %v684_v27 }
 0x1f1   :  { %641 = vmatpush3.xpose.msra.mxu0 %v390_v13 }
 0x1f2   :  { %642 = vmatprep.subr.mxu0 %v684_v27 }
 0x1f5   :  { %643 = vmatpush3.xpose.msra.mxu0 %v389_v14 }
 0x1f8   :  { %645 = vmatmul.mubr.f32.vlgmr.msra.gmra.mxu0 %v405_v15 }
 0x2b8   :  { %v478_v17 = vpop.f32.mrf.mxu0 }
 0x2b9   :  { %v479_v18 = vadd.f32 %v478_v17, %v410_v16 }
 0x2ba   :  { %v646_v19 = vpop.f32.mrf.mxu0 }
 0x2bb   :  { %482 = vst [vmem:[#allocation2] sm:$0xff] %v479_v18 }
 0x2bc   :  { %673 = shalt.err (!%p670_p4)
}
 0x2bd   :  { %492 = dma.vmem_to_hbm [thread:$0]  %s490_s9, 128, %s862_s7, [#allocation3]  }
 0x2be   :  { %682 = dma.done.wait [#allocation3], 128  }
 0x2bf   :  { %683 = vsyncadd [#allocation3], 4294967168 }
 0x2c0   :  { %496 = vsyncpa [#allocation3], 1 }

</bundles_post_ra>
